<compile_context>
chip_gen: v5e
topology: v5e:2x2
jax: 0.10.0
libtpu: 0.0.40
codegen_flags: <defaults>
</compile_context>

<pallas_src>
import jax
import jax.numpy as jnp
from jax.experimental import pallas as pl
from jax.experimental.pallas import tpu as pltpu


def _round_up(x, m):
    return ((x + m - 1) // m) * m


def mlp_kernel(x_ref, w_ref, b_ref, o_ref, acc_ref):
    k = pl.program_id(1)

    @pl.when(k == 0)
    def _init():
        acc_ref[...] = jnp.zeros_like(acc_ref)

    # W arrives pre-packed in bf16 (no per-step full-weight cast); x is cast
    # on the fly. f32 accumulation on the MXU via preferred_element_type.
    acc_ref[...] += jnp.dot(x_ref[...].astype(jnp.bfloat16), w_ref[...],
                            preferred_element_type=jnp.float32)

    @pl.when(k == pl.num_programs(1) - 1)
    def _finalize():
        o_ref[...] = (acc_ref[...] + b_ref[...]).astype(o_ref.dtype)


def _choose_tiles(n, in_p, out_p, max_tile_n=1024):
    """Pick (tile_n, tile_k, vmem_limit) against this chip's VMEM budget."""
    try:
        vmem_bytes = int(pltpu.get_tpu_info().vmem_capacity_bytes)
    except Exception:
        vmem_bytes = 64 * 1024 * 1024          # conservative: v7x per-TC VMEM
    budget = int(vmem_bytes * 0.70)            # headroom for compiler scratch

    # ---- row tile -----------------------------------------------------------
    if n >= 512:
        # >= 2 row tiles so both v7x TensorCores get work; 256-multiples match
        # the v6e/v7x MXU cadence.
        tile_n = min(_round_up(max_tile_n, 256), _round_up(pl.cdiv(n, 2), 256))
    elif n >= 256:
        tile_n = _round_up(n, 256)
    else:
        tile_n = _round_up(max(n, 1), 8)
    tile_n = max(8, min(tile_n, _round_up(n, 8)))

    # ---- VMEM model (counts double-buffered IO + in-kernel bf16 x copy) -----
    def vmem_usage(tn, tk):
        x_io = 2 * tn * tk * 4          # double-buffered f32 x tiles
        x_bf = tn * tk * 2              # in-kernel bf16 copy of x
        w_io = 2 * tk * out_p * 2       # double-buffered bf16 W slabs
        b_io = 2 * out_p * 4            # double-buffered f32 bias
        o_io = 2 * tn * out_p * 4       # double-buffered f32 out tiles
        acc = tn * out_p * 4            # accumulator scratch
        return x_io + x_bf + w_io + b_io + o_io + acc

    # ---- K tile: prefer full K (W resident across the row sweep); otherwise
    # the largest 128-multiple that divides in_p and fits. --------------------
    def pick_tile_k(tn):
        m = in_p // 128
        for k_tiles in range(1, m + 1):
            if m % k_tiles:
                continue
            tk = in_p // k_tiles
            if vmem_usage(tn, tk) <= budget:
                return tk
        return 128

    tile_k = pick_tile_k(tile_n)
    while vmem_usage(tile_n, tile_k) > budget and tile_n > 8:
        tile_n = _round_up(max(tile_n // 2, 8), 8)
        tile_k = pick_tile_k(tile_n)
    # TODO(synk): add an out_p grid axis for layers too wide for even tile_k=128.

    vmem_limit = min(int(vmem_bytes * 0.85),
                     max(vmem_usage(tile_n, tile_k) * 2, 16 * 1024 * 1024))
    return tile_n, tile_k, vmem_limit


def pack_linear_params(weight, bias):
    """One-time pack of nn.Linear params: transpose, pad to 128 lanes, bf16 W."""
    out_dim, in_dim = weight.shape
    in_p = _round_up(in_dim, 128)
    out_p = _round_up(out_dim, 128)
    w_packed = jnp.zeros((in_p, out_p), jnp.bfloat16).at[:in_dim, :out_dim].set(
        weight.T.astype(jnp.bfloat16))
    b_packed = jnp.zeros((1, out_p), jnp.float32).at[:, :out_dim].set(
        bias.astype(jnp.float32).reshape(1, -1))
    return w_packed, b_packed, out_dim


def mlp_forward_packed(x, w_packed, b_packed, out_dim, *, max_tile_n=1024,
                       out_dtype=jnp.float32):
    """Forward with pre-packed params (reuse the pack across calls).

    x:        (N, in_dim)   float32
    w_packed: (in_p, out_p) bfloat16   (padded W.T)
    b_packed: (1, out_p)    float32    (padded bias)
    returns   (N, out_dim)  out_dtype
    """
    n, in_dim = x.shape
    in_p, out_p = w_packed.shape
    x_p = x if in_p == in_dim else jnp.pad(x, ((0, 0), (0, in_p - in_dim)))

    tile_n, tile_k, vmem_limit = _choose_tiles(n, in_p, out_p, max_tile_n)
    grid = (pl.cdiv(n, tile_n), in_p // tile_k)   # reduction axis last

    flops = int(2 * n * in_p * out_p)
    bytes_accessed = int(4 * n * in_p + 2 * in_p * out_p + 4 * out_p
                         + jnp.dtype(out_dtype).itemsize * n * out_p)

    out_padded = pl.pallas_call(
        mlp_kernel,
        out_shape=jax.ShapeDtypeStruct((n, out_p), out_dtype),
        grid=grid,
        in_specs=[
            pl.BlockSpec((tile_n, tile_k), lambda i, k: (i, k)),  # x row/K tiles
            pl.BlockSpec((tile_k, out_p), lambda i, k: (k, 0)),   # bf16 W slab
            pl.BlockSpec((1, out_p), lambda i, k: (0, 0)),        # bias (const)
        ],
        out_specs=pl.BlockSpec((tile_n, out_p), lambda i, k: (i, 0)),
        scratch_shapes=[pltpu.VMEM((tile_n, out_p), jnp.float32)],
        compiler_params=pltpu.CompilerParams(
            dimension_semantics=("parallel", "arbitrary"),
            vmem_limit_bytes=int(vmem_limit),
        ),
        cost_estimate=pl.CostEstimate(
            flops=flops, transcendentals=0, bytes_accessed=bytes_accessed),
    )(x_p, w_packed, b_packed)

    return out_padded[:, :out_dim]


def mlp_forward(x, weight, bias, **kwargs):
    """Convenience wrapper matching the PyTorch MLP.forward (packs per call)."""
    w_packed, b_packed, out_dim = pack_linear_params(weight, bias)
    return mlp_forward_packed(x, w_packed, b_packed, out_dim, **kwargs)


if __name__ == "__main__":
    # Small shapes consistent with MLP(in_dim, out_dim): N rows of features.
    N, IN_DIM, OUT_DIM = 64, 32, 16

    key = jax.random.PRNGKey(0)
    k_x, k_w, k_b = jax.random.split(key, 3)

    x = jax.random.normal(k_x, (N, IN_DIM), dtype=jnp.float32)
    bound = 1.0 / (IN_DIM ** 0.5)
    weight = jax.random.uniform(k_w, (OUT_DIM, IN_DIM), jnp.float32, -bound, bound)
    bias = jax.random.uniform(k_b, (OUT_DIM,), jnp.float32, -bound, bound)

    # Pack once (hoisted out of the per-call path), then run the kernel.
    w_packed, b_packed, out_dim = pack_linear_params(weight, bias)
    out = mlp_forward_packed(x, w_packed, b_packed, out_dim)
    jax.block_until_ready(out)

    # Tight check against a reference using the same bf16 operand rounding.
    ref_bf16 = jnp.dot(x.astype(jnp.bfloat16), weight.T.astype(jnp.bfloat16),
                       preferred_element_type=jnp.float32) + bias[None, :]
    assert jnp.allclose(out, ref_bf16, atol=1e-4, rtol=1e-4)

    # Loose check against the full-f32 PyTorch-equivalent Linear.
    ref_f32 = x @ weight.T + bias[None, :]
    assert jnp.allclose(out, ref_f32, atol=5e-2, rtol=5e-2)

    print("KERNEL_OK")
</pallas_src>

<mosaic_0001>
module attributes {stable_mosaic.version = 11 : i64} {
  func.func @mlp_kernel(%arg0: i32, %arg1: i32, %arg2: memref<64x128xf32, #tpu.memory_space<vmem>>, %arg3: memref<128x128xbf16, #tpu.memory_space<vmem>>, %arg4: memref<1x128xf32, #tpu.memory_space<vmem>>, %arg5: memref<64x128xf32, #tpu.memory_space<vmem>>, %arg6: memref<64x128xf32, #tpu.memory_space<vmem>>) attributes {dimension_semantics = [#tpu.dimension_semantics<parallel>, #tpu.dimension_semantics<arbitrary>], iteration_bounds = array<i64: 1, 1>, scalar_prefetch = 0 : i64, scratch_operands = 1 : i64, tpu.core_type = #tpu.core_type<tc>, window_params = [{transform_indices = @transform_0, window_bounds = array<i64: 64, 128>}, {transform_indices = @transform_1, window_bounds = array<i64: 128, 128>}, {pipeline_mode = #tpu.pipeline_mode<synchronous>, transform_indices = @transform_2, window_bounds = array<i64: 1, 128>}, {transform_indices = @transform_3, window_bounds = array<i64: 64, 128>}]} {
    %c0_i32 = arith.constant 0 : i32
    %0 = arith.cmpi eq, %arg1, %c0_i32 : i32
    %1 = arith.extui %0 : i1 to i32
    %c0_i32_0 = arith.constant 0 : i32
    %2 = arith.cmpi ne, %1, %c0_i32_0 : i32
    scf.if %2 {
      %cst_10 = arith.constant 0.000000e+00 : f32
      %13 = vector.broadcast %cst_10 : f32 to vector<64x128xf32>
      %c0_11 = arith.constant 0 : index
      %c0_12 = arith.constant 0 : index
      %14 = vector.load %arg6[%c0_11, %c0_12] : memref<64x128xf32, #tpu.memory_space<vmem>>, vector<64x128xf32>
      tpu.vector_store %arg6[%c0_11, %c0_12], %13 {strides = array<i32>} : memref<64x128xf32, #tpu.memory_space<vmem>>, vector<64x128xf32>,
    } else {
    }
    %c0 = arith.constant 0 : index
    %c0_1 = arith.constant 0 : index
    %3 = vector.load %arg6[%c0, %c0_1] : memref<64x128xf32, #tpu.memory_space<vmem>>, vector<64x128xf32>
    %c0_2 = arith.constant 0 : index
    %c0_3 = arith.constant 0 : index
    %4 = vector.load %arg2[%c0_2, %c0_3] : memref<64x128xf32, #tpu.memory_space<vmem>>, vector<64x128xf32>
    %5 = arith.truncf %4 : vector<64x128xf32> to vector<64x128xbf16>
    %c0_4 = arith.constant 0 : index
    %c0_5 = arith.constant 0 : index
    %6 = vector.load %arg3[%c0_4, %c0_5] : memref<128x128xbf16, #tpu.memory_space<vmem>>, vector<128x128xbf16>
    %cst = arith.constant dense<0.000000e+00> : vector<64x128xf32>
    %7 = tpu.matmul %5, %6, %cst {dimension_numbers = #tpu.dot_dimension_numbers<[1], [0], [0], [1], [0, 0, 1, 1], [], []>} : vector<64x128xbf16>, vector<128x128xbf16>, vector<64x128xf32> -> vector<64x128xf32>
    %8 = arith.addf %3, %7 : vector<64x128xf32>
    %c0_6 = arith.constant 0 : index
    %c0_7 = arith.constant 0 : index
    %9 = vector.load %arg6[%c0_6, %c0_7] : memref<64x128xf32, #tpu.memory_space<vmem>>, vector<64x128xf32>
    tpu.vector_store %arg6[%c0_6, %c0_7], %8 {strides = array<i32>} : memref<64x128xf32, #tpu.memory_space<vmem>>, vector<64x128xf32>,
    %c0_i32_8 = arith.constant 0 : i32
    %10 = arith.cmpi eq, %arg1, %c0_i32_8 : i32
    %11 = arith.extui %10 : i1 to i32
    %c0_i32_9 = arith.constant 0 : i32
    %12 = arith.cmpi ne, %11, %c0_i32_9 : i32
    scf.if %12 {
      %c0_10 = arith.constant 0 : index
      %c0_11 = arith.constant 0 : index
      %13 = vector.load %arg6[%c0_10, %c0_11] : memref<64x128xf32, #tpu.memory_space<vmem>>, vector<64x128xf32>
      %c0_12 = arith.constant 0 : index
      %c0_13 = arith.constant 0 : index
      %14 = vector.load %arg4[%c0_12, %c0_13] : memref<1x128xf32, #tpu.memory_space<vmem>>, vector<1x128xf32>
      %15 = vector.broadcast %14 : vector<1x128xf32> to vector<64x128xf32>
      %16 = arith.addf %13, %15 : vector<64x128xf32>
      %c0_14 = arith.constant 0 : index
      %c0_15 = arith.constant 0 : index
      %17 = vector.load %arg5[%c0_14, %c0_15] : memref<64x128xf32, #tpu.memory_space<vmem>>, vector<64x128xf32>
      tpu.vector_store %arg5[%c0_14, %c0_15], %16 {strides = array<i32>} : memref<64x128xf32, #tpu.memory_space<vmem>>, vector<64x128xf32>,
    } else {
    }
    return
  }
  func.func @transform_0(%arg0: i32, %arg1: i32) -> (i32, i32) {
    %c0_i32 = arith.constant 0 : i32
    return %arg0, %arg1 : i32, i32
  }
  func.func @transform_1(%arg0: i32, %arg1: i32) -> (i32, i32) {
    %c0_i32 = arith.constant 0 : i32
    %c0_i32_0 = arith.constant 0 : i32
    return %arg1, %c0_i32 : i32, i32
  }
  func.func @transform_2(%arg0: i32, %arg1: i32) -> (i32, i32) {
    %c0_i32 = arith.constant 0 : i32
    %c0_i32_0 = arith.constant 0 : i32
    %c0_i32_1 = arith.constant 0 : i32
    return %c0_i32, %c0_i32_0 : i32, i32
  }
  func.func @transform_3(%arg0: i32, %arg1: i32) -> (i32, i32) {
    %c0_i32 = arith.constant 0 : i32
    %c0_i32_0 = arith.constant 0 : i32
    return %arg0, %c0_i32 : i32, i32
  }
}

</mosaic_0001>

<bundles_post_ra>
// kernel: tpu_custom_call.1
= control target key start
LH: loop header
LB: loop body
LE: loop exit
PB: predicated region body
PF: predicated region fallthrough
CT: control target
= control target key end

     0   :  { %8 = vsyncpa [#allocation4], 0  ;;  %s434_s0 = inlined_call_operand.hbm [shape: f32[64,128], index: 0, kind: input, shape index: {}]   ;;  %s435_s1 = inlined_call_operand.hbm [shape: bf16[128,128], index: 1, kind: input, shape index: {}]   ;;  %s436_s2 = inlined_call_operand.vmem [shape: f32[1,128], index: 2, kind: input, shape index: {}]   ;;  %s437_s3 = inlined_call_operand.hbm [shape: f32[64,128], index: 3, kind: output, shape index: {}]  }
   0x1   :  { %9 = vsyncpa [#allocation7], 0 }
   0x2   :  { %10 = vsyncpa [#allocation5], 0  ;;  %s15_s14 = sshll.u32 %s434_s0, 4  ;;  %s389_s15 = smov [#allocation3]   ;;  %s16_s14 = int_to_ptr.hbm [resolvable:$true] %s15_s14 }
   0x3   :  { %s17_s16 = sshll.u32 %s389_s15, 4  ;;  %s28_s19 = sshll.u32 %s435_s1, 4  ;;  %s18_s16 = int_to_ptr.vmem [resolvable:$true] %s17_s16  ;;  %s29_s19 = int_to_ptr.hbm [resolvable:$true] %s28_s19 }
   0x4   :  { %s390_s20 = smov 128   ;;  %s391_s21 = smov 8  }
   0x5   :  { %23 = dma.hbm_to_vmem [thread:$0]  %s16_s14, 1024, %s18_s16, [#allocation4], %s390_s20, %s390_s20, %s391_s21  }
   0x6   :  { %s392_s22 = smov [#allocation6]   ;;  %s393_s24 = smov 64  }
   0x7   :  { %s30_s23 = sshll.u32 %s392_s22, 4  ;;  %s394_s0 = smov 4   ;;  %s31_s23 = int_to_ptr.vmem [resolvable:$true] %s30_s23 }
   0x8   :  { %36 = dma.hbm_to_vmem [thread:$0]  %s29_s19, 1024, %s31_s23, [#allocation7], %s393_s24, %s393_s24, %s394_s0  }
   0x9   :  { %383 = dma.done.wait [#allocation4], 1024  }
   0xa   :  { %384 = vsyncadd [#allocation4], 4294966272 }
   0xb   :  { %385 = dma.done.wait [#allocation7], 1024  }
   0xc   :  { %386 = vsyncadd [#allocation7], 4294966272  ;;  %v278_v0 = vld [vmem:[#allocation6 + $0x38] sm:$0xff]  ;;  %v277_v1 = vld [vmem:[#allocation6 + $0x30] sm:$0xff]  ;;  %s395_s26 = smov [#allocation8]   ;;  %s225_s29 = sshll.u32 %s437_s3, 4  ;;  %s226_s29 = int_to_ptr.hbm [resolvable:$true] %s225_s29 }
   0xd   :  { %143 = vmatpush.bf16.msra.mxu0 %v278_v0  ;;  %279 = vmatpush.bf16.msra.mxu1 %v278_v0  ;;  %v276_v2 = vld [vmem:[#allocation6 + $0x28] sm:$0xff]  ;;  %v275_v3 = vld [vmem:[#allocation6 + $0x20] sm:$0xff]  ;;  %v274_v4 = vld [vmem:[#allocation6 + $0x18] sm:$0xff] }
   0xe   :  { %280 = vmatpush.bf16.msra.mxu2 %v278_v0  ;;  %281 = vmatpush.bf16.msra.mxu3 %v278_v0  ;;  %v273_v5 = vld [vmem:[#allocation6 + $0x10] sm:$0xff]  ;;  %v272_v6 = vld [vmem:[#allocation6 + $0x8] sm:$0xff]  ;;  %v271_v7 = vld [vmem:[#allocation6] sm:$0xff] }
   0xf   :  { %v67_v8 = vld [vmem:[#allocation3] sm:$0xff]  ;;  %v68_v9 = vld [vmem:[#allocation3 + $0x8] sm:$0xff]  ;;  %v69_v10 = vld [vmem:[#allocation3 + $0x10] sm:$0xff] }
  0x10   :  { %v70_v11 = vld [vmem:[#allocation3 + $0x18] sm:$0xff]  ;;  %v71_v12 = vld [vmem:[#allocation3 + $0x20] sm:$0xff]  ;;  %v72_v13 = vld [vmem:[#allocation3 + $0x28] sm:$0xff]  ;;  %v75_v16 = vpack.c.bf16 %v68_v9, %v67_v8 }
  0x11   :  { %144 = vmatpush.bf16.msra.mxu0 %v277_v1  ;;  %282 = vmatpush.bf16.msra.mxu1 %v277_v1  ;;  %v73_v14 = vld [vmem:[#allocation3 + $0x30] sm:$0xff]  ;;  %v74_v15 = vld [vmem:[#allocation3 + $0x38] sm:$0xff]  ;;  %v76_v17 = vpack.c.bf16 %v70_v11, %v69_v10  ;;  %v77_v18 = vpack.c.bf16 %v72_v13, %v71_v12  ;;  %v310_v20 = vld [vmem:[%s436_s2] ss:$0 sm:$0xff]  ;;  %s223_s2 = sshll.u32 %s395_s26, 4  ;;  %s224_s2 = int_to_ptr.vmem [resolvable:$true] %s223_s2 }
  0x12   :  { %283 = vmatpush.bf16.msra.mxu2 %v277_v1  ;;  %284 = vmatpush.bf16.msra.mxu3 %v277_v1  ;;  %v78_v19 = vpack.c.bf16 %v74_v15, %v73_v14 }
  0x15   :  { %145 = vmatpush.bf16.msra.mxu0 %v276_v2  ;;  %285 = vmatpush.bf16.msra.mxu1 %v276_v2 }
  0x16   :  { %286 = vmatpush.bf16.msra.mxu2 %v276_v2  ;;  %287 = vmatpush.bf16.msra.mxu3 %v276_v2 }
  0x19   :  { %146 = vmatpush.bf16.msra.mxu0 %v275_v3  ;;  %288 = vmatpush.bf16.msra.mxu1 %v275_v3 }
  0x1a   :  { %289 = vmatpush.bf16.msra.mxu2 %v275_v3  ;;  %290 = vmatpush.bf16.msra.mxu3 %v275_v3 }
  0x1d   :  { %147 = vmatpush.bf16.msra.mxu0 %v274_v4  ;;  %291 = vmatpush.bf16.msra.mxu1 %v274_v4 }
  0x1e   :  { %292 = vmatpush.bf16.msra.mxu2 %v274_v4  ;;  %293 = vmatpush.bf16.msra.mxu3 %v274_v4 }
  0x21   :  { %148 = vmatpush.bf16.msra.mxu0 %v273_v5  ;;  %294 = vmatpush.bf16.msra.mxu1 %v273_v5 }
  0x22   :  { %295 = vmatpush.bf16.msra.mxu2 %v273_v5  ;;  %296 = vmatpush.bf16.msra.mxu3 %v273_v5 }
  0x25   :  { %149 = vmatpush.bf16.msra.mxu0 %v272_v6  ;;  %297 = vmatpush.bf16.msra.mxu1 %v272_v6 }
  0x26   :  { %298 = vmatpush.bf16.msra.mxu2 %v272_v6  ;;  %299 = vmatpush.bf16.msra.mxu3 %v272_v6 }
  0x29   :  { %150 = vmatpush.bf16.msra.mxu0 %v271_v7  ;;  %300 = vmatpush.bf16.msra.mxu1 %v271_v7 }
  0x2a   :  { %301 = vmatpush.bf16.msra.mxu2 %v271_v7  ;;  %302 = vmatpush.bf16.msra.mxu3 %v271_v7 }
  0x2c   :  { %151 = vmatmul.bf16.vlgmr.msra.gmra.mxu0 %v75_v16  ;;  %156 = vmatmul.bf16.vlgmr.msra.gmra.mxu1 %v76_v17 }
  0x2d   :  { %161 = vmatmul.bf16.vlgmr.msra.gmra.mxu2 %v77_v18  ;;  %166 = vmatmul.bf16.vlgmr.msra.gmra.mxu3 %v78_v19 }
  0xa9   :  { %v152_v21 = vpop.f32.mrf.mxu0  ;;  %v157_v22 = vpop.f32.mrf.mxu1 }
  0xaa   :  { %v203_v23 = vadd.f32 %v310_v20, %v152_v21  ;;  %v205_v24 = vadd.f32 %v310_v20, %v157_v22 }
  0xac   :  { %211 = vst [vmem:[#allocation8] sm:$0xff] %v203_v23 }
  0xad   :  { %213 = vst [vmem:[#allocation8 + $0x10] sm:$0xff] %v205_v24 }
  0xb0   :  { %v162_v25 = vpop.f32.mrf.mxu2  ;;  %v167_v26 = vpop.f32.mrf.mxu3 }
  0xb1   :  { %v207_v27 = vadd.f32 %v310_v20, %v162_v25  ;;  %v209_v28 = vadd.f32 %v310_v20, %v167_v26  ;;  %v154_v29 = vpop.f32.mrf.mxu0  ;;  %v159_v30 = vpop.f32.mrf.mxu1 }
  0xb2   :  { %v204_v31 = vadd.f32 %v310_v20, %v154_v29  ;;  %v206_v32 = vadd.f32 %v310_v20, %v159_v30 }
  0xb3   :  { %215 = vst [vmem:[#allocation8 + $0x20] sm:$0xff] %v207_v27 }
  0xb4   :  { %217 = vst [vmem:[#allocation8 + $0x30] sm:$0xff] %v209_v28 }
  0xb5   :  { %212 = vst [vmem:[#allocation8 + $0x8] sm:$0xff] %v204_v31 }
  0xb6   :  { %214 = vst [vmem:[#allocation8 + $0x18] sm:$0xff] %v206_v32 }
  0xb8   :  { %v164_v33 = vpop.f32.mrf.mxu2  ;;  %v169_v34 = vpop.f32.mrf.mxu3 }
  0xb9   :  { %v208_v35 = vadd.f32 %v310_v20, %v164_v33  ;;  %v210_v36 = vadd.f32 %v310_v20, %v169_v34 }
  0xbb   :  { %216 = vst [vmem:[#allocation8 + $0x28] sm:$0xff] %v208_v35 }
  0xbc   :  { %218 = vst [vmem:[#allocation8 + $0x38] sm:$0xff] %v210_v36 }
  0xbd   :  { %231 = dma.vmem_to_hbm [thread:$0]  %s224_s2, 1024, %s226_s29, [#allocation5], %s390_s20, %s390_s20, %s391_s21  }
  0xbe   :  { %387 = dma.done.wait [#allocation5], 1024  }
  0xbf   :  { %388 = vsyncadd [#allocation5], 4294966272 }
  0xc0   :  { %236 = vsyncpa [#allocation4], 1 }
  0xc1   :  { %237 = vsyncpa [#allocation7], 1 }
  0xc2   :  { %238 = vsyncpa [#allocation5], 1 }

</bundles_post_ra>
